<compile_context>
chip_gen: v5e
topology: v5e:2x2
jax: 0.10.0
libtpu: 0.0.40
codegen_flags: <defaults>
</compile_context>

<pallas_src>
import functools

import jax
import jax.numpy as jnp
from jax.experimental import pallas as pl
from jax.experimental.pallas import tpu as pltpu


def _concat_pool_kernel(x_ref, o_ref, max_sc, sum_sc, *, C, HW, THW, needs_mask):
    # x_ref: (TN, C, THW) tile of the (N, C, H*W) activation.
    # o_ref: (TN, 2*C) output block, resident across the spatial grid axis.
    # max_sc / sum_sc: (TN, C) f32 VMEM accumulators.
    k = pl.program_id(1)

    @pl.when(k == 0)
    def _init():
        max_sc[...] = jnp.full_like(max_sc, -jnp.inf)
        sum_sc[...] = jnp.zeros_like(sum_sc)

    x = x_ref[...]  # native dtype (f32 or bf16)

    if needs_mask:
        # Last spatial tile is partial: mask padded lanes out of both paths.
        valid = HW - k * THW
        lane = jax.lax.broadcasted_iota(jnp.int32, x.shape, 2)
        in_bounds = lane < valid
        x_max = jnp.where(in_bounds, x, jnp.asarray(-jnp.inf, dtype=x.dtype))
        x_sum = jnp.where(in_bounds, x, jnp.asarray(0, dtype=x.dtype))
    else:
        x_max = x
        x_sum = x

    # Max is exact in the native dtype; only the sum needs f32 accumulation.
    tile_max = jnp.max(x_max, axis=-1).astype(jnp.float32)       # (TN, C)
    tile_sum = jnp.sum(x_sum, axis=-1, dtype=jnp.float32)        # (TN, C)

    max_sc[...] = jnp.maximum(max_sc[...], tile_max)
    sum_sc[...] = sum_sc[...] + tile_sum

    @pl.when(k == pl.num_programs(1) - 1)
    def _finalize():
        o_ref[:, 0:C] = max_sc[...].astype(o_ref.dtype)
        o_ref[:, C:2 * C] = (sum_sc[...] * (1.0 / float(HW))).astype(o_ref.dtype)


def _choose_tiles(N, C, HW, itemsize,
                  max_tile_bytes=8 * 1024 * 1024, target_thw=512):
    """Pick (TN, THW) respecting the (8, 128) block constraint and VMEM."""
    # Output block is (TN, 2*C): TN must be a multiple of 8 or equal N.
    TN = N if N < 8 else 8
    if HW <= 128:
        THW = HW  # full spatial extent (block dim == array dim is allowed)
    else:
        per_lane_bytes = max(1, TN * C * itemsize)
        budget_thw = max(128, (max_tile_bytes // per_lane_bytes) // 128 * 128)
        THW = min(target_thw, budget_thw, (HW // 128) * 128)
        THW = max(THW, 128)
    return TN, THW


def cnn_model_forward(x):
    """CNNModel (params=[]) forward: identity features ->
    AdaptiveConcatPool2d(1) -> Flatten, i.e. concat([max, avg]) pooling."""
    N, C, H, W = x.shape
    HW = H * W
    x3 = x.reshape(N, C, HW)

    itemsize = jnp.dtype(x.dtype).itemsize
    TN, THW = _choose_tiles(N, C, HW, itemsize)
    needs_mask = (HW % THW) != 0
    grid = (pl.cdiv(N, TN), pl.cdiv(HW, THW))

    kernel = functools.partial(
        _concat_pool_kernel, C=C, HW=HW, THW=THW, needs_mask=needs_mask)

    cost = pl.CostEstimate(
        flops=2 * N * C * HW,
        transcendentals=0,
        bytes_accessed=N * C * HW * itemsize + N * 2 * C * itemsize,
    )

    return pl.pallas_call(
        kernel,
        out_shape=jax.ShapeDtypeStruct((N, 2 * C), x.dtype),
        grid_spec=pltpu.PrefetchScalarGridSpec(
            num_scalar_prefetch=0,
            grid=grid,
            in_specs=[pl.BlockSpec((TN, C, THW), lambda i, k: (i, 0, k))],
            out_specs=pl.BlockSpec((TN, 2 * C), lambda i, k: (i, 0)),
            scratch_shapes=[
                pltpu.VMEM((TN, C), jnp.float32),   # running max
                pltpu.VMEM((TN, C), jnp.float32),   # running sum
            ],
        ),
        compiler_params=pltpu.CompilerParams(
            dimension_semantics=("parallel", "arbitrary"),
            vmem_limit_bytes=32 * 1024 * 1024,
        ),
        cost_estimate=cost,
    )(x3)


def _reference_forward(x):
    # Pure-JAX reference (computed in f32 for a stable comparison).
    xf = x.astype(jnp.float32)
    mx = jnp.max(xf, axis=(2, 3))
    av = jnp.mean(xf, axis=(2, 3))
    return jnp.concatenate([mx, av], axis=1)


def _check(x, atol, rtol):
    out = jax.block_until_ready(cnn_model_forward(x))
    ref = _reference_forward(x)
    N, C = x.shape[0], x.shape[1]
    assert out.shape == (N, 2 * C), out.shape
    assert jnp.allclose(out.astype(jnp.float32), ref, atol=atol, rtol=rtol), \
        "mismatch vs reference"


if __name__ == "__main__":
    key = jax.random.PRNGKey(0)

    # Primary small shape implied by the module (batch=2, channels=4, 16x16).
    x = jax.random.normal(key, (2, 4, 16, 16), dtype=jnp.float32)
    _check(x, atol=1e-5, rtol=1e-5)

    # Larger spatial extent: exercises the multi-step spatial reduction and
    # the masked remainder tile (48*48 = 2304 = 4*512 + 256).
    x2 = jax.random.normal(jax.random.PRNGKey(1), (3, 4, 48, 48),
                           dtype=jnp.float32)
    _check(x2, atol=1e-5, rtol=1e-5)

    # bf16 path: max in bf16, sum accumulated in f32.
    x3 = x2.astype(jnp.bfloat16)
    _check(x3, atol=2e-2, rtol=2e-2)

    print("KERNEL_OK")
</pallas_src>

<mosaic_0001>
module attributes {stable_mosaic.version = 11 : i64} {
  func.func @_concat_pool_kernel(%arg0: i32, %arg1: i32, %arg2: memref<2x4x256xf32, #tpu.memory_space<vmem>>, %arg3: memref<2x8xf32, #tpu.memory_space<vmem>>, %arg4: memref<2x4xf32, #tpu.memory_space<vmem>>, %arg5: memref<2x4xf32, #tpu.memory_space<vmem>>) attributes {dimension_semantics = [#tpu.dimension_semantics<parallel>, #tpu.dimension_semantics<arbitrary>], iteration_bounds = array<i64: 1, 1>, scalar_prefetch = 0 : i64, scratch_operands = 2 : i64, tpu.core_type = #tpu.core_type<tc>, window_params = [{transform_indices = @transform_0, window_bounds = array<i64: 2, 4, 256>}, {transform_indices = @transform_1, window_bounds = array<i64: 2, 8>}]} {
    %c0_i32 = arith.constant 0 : i32
    %0 = arith.cmpi eq, %arg1, %c0_i32 : i32
    %1 = arith.extui %0 : i1 to i32
    %c0_i32_0 = arith.constant 0 : i32
    %2 = arith.cmpi ne, %1, %c0_i32_0 : i32
    scf.if %2 {
      %cst_14 = arith.constant 0xFF800000 : f32
      %15 = vector.broadcast %cst_14 : f32 to vector<2x4xf32>
      %c0_15 = arith.constant 0 : index
      %c0_16 = arith.constant 0 : index
      %16 = vector.load %arg4[%c0_15, %c0_16] : memref<2x4xf32, #tpu.memory_space<vmem>>, vector<2x4xf32>
      tpu.vector_store %arg4[%c0_15, %c0_16], %15 {strides = array<i32>} : memref<2x4xf32, #tpu.memory_space<vmem>>, vector<2x4xf32>,
      %cst_17 = arith.constant 0.000000e+00 : f32
      %17 = vector.broadcast %cst_17 : f32 to vector<2x4xf32>
      %c0_18 = arith.constant 0 : index
      %c0_19 = arith.constant 0 : index
      %18 = vector.load %arg5[%c0_18, %c0_19] : memref<2x4xf32, #tpu.memory_space<vmem>>, vector<2x4xf32>
      tpu.vector_store %arg5[%c0_18, %c0_19], %17 {strides = array<i32>} : memref<2x4xf32, #tpu.memory_space<vmem>>, vector<2x4xf32>,
    } else {
    }
    %c0 = arith.constant 0 : index
    %c0_1 = arith.constant 0 : index
    %c0_2 = arith.constant 0 : index
    %3 = vector.load %arg2[%c0, %c0_1, %c0_2] : memref<2x4x256xf32, #tpu.memory_space<vmem>>, vector<2x4x256xf32>
    %cst = arith.constant dense<0xFF800000> : vector<2x4xf32>
    %4 = vector.multi_reduction <maximumf>, %3, %cst [2] : vector<2x4x256xf32> to vector<2x4xf32>
    %cst_3 = arith.constant dense<0.000000e+00> : vector<2x4xf32>
    %5 = vector.multi_reduction <add>, %3, %cst_3 [2] : vector<2x4x256xf32> to vector<2x4xf32>
    %c0_4 = arith.constant 0 : index
    %c0_5 = arith.constant 0 : index
    %6 = vector.load %arg4[%c0_4, %c0_5] : memref<2x4xf32, #tpu.memory_space<vmem>>, vector<2x4xf32>
    %7 = arith.maximumf %6, %4 : vector<2x4xf32>
    %c0_6 = arith.constant 0 : index
    %c0_7 = arith.constant 0 : index
    %8 = vector.load %arg4[%c0_6, %c0_7] : memref<2x4xf32, #tpu.memory_space<vmem>>, vector<2x4xf32>
    tpu.vector_store %arg4[%c0_6, %c0_7], %7 {strides = array<i32>} : memref<2x4xf32, #tpu.memory_space<vmem>>, vector<2x4xf32>,
    %c0_8 = arith.constant 0 : index
    %c0_9 = arith.constant 0 : index
    %9 = vector.load %arg5[%c0_8, %c0_9] : memref<2x4xf32, #tpu.memory_space<vmem>>, vector<2x4xf32>
    %10 = arith.addf %9, %5 : vector<2x4xf32>
    %c0_10 = arith.constant 0 : index
    %c0_11 = arith.constant 0 : index
    %11 = vector.load %arg5[%c0_10, %c0_11] : memref<2x4xf32, #tpu.memory_space<vmem>>, vector<2x4xf32>
    tpu.vector_store %arg5[%c0_10, %c0_11], %10 {strides = array<i32>} : memref<2x4xf32, #tpu.memory_space<vmem>>, vector<2x4xf32>,
    %c0_i32_12 = arith.constant 0 : i32
    %12 = arith.cmpi eq, %arg1, %c0_i32_12 : i32
    %13 = arith.extui %12 : i1 to i32
    %c0_i32_13 = arith.constant 0 : i32
    %14 = arith.cmpi ne, %13, %c0_i32_13 : i32
    scf.if %14 {
      %c0_14 = arith.constant 0 : index
      %c0_15 = arith.constant 0 : index
      %15 = vector.load %arg4[%c0_14, %c0_15] : memref<2x4xf32, #tpu.memory_space<vmem>>, vector<2x4xf32>
      %c0_16 = arith.constant 0 : index
      %c0_17 = arith.constant 0 : index
      %16 = vector.load %arg3[%c0_16, %c0_17] : memref<2x8xf32, #tpu.memory_space<vmem>>, vector<2x4xf32>
      tpu.vector_store %arg3[%c0_16, %c0_17], %15 {strides = array<i32>} : memref<2x8xf32, #tpu.memory_space<vmem>>, vector<2x4xf32>,
      %c0_18 = arith.constant 0 : index
      %c0_19 = arith.constant 0 : index
      %17 = vector.load %arg5[%c0_18, %c0_19] : memref<2x4xf32, #tpu.memory_space<vmem>>, vector<2x4xf32>
      %cst_20 = arith.constant 3.906250e-03 : f32
      %18 = vector.broadcast %cst_20 : f32 to vector<2x4xf32>
      %19 = arith.mulf %17, %18 : vector<2x4xf32>
      %c0_21 = arith.constant 0 : index
      %c4 = arith.constant 4 : index
      %20 = vector.load %arg3[%c0_21, %c4] : memref<2x8xf32, #tpu.memory_space<vmem>>, vector<2x4xf32>
      tpu.vector_store %arg3[%c0_21, %c4], %19 {strides = array<i32>} : memref<2x8xf32, #tpu.memory_space<vmem>>, vector<2x4xf32>,
    } else {
    }
    return
  }
  func.func @transform_0(%arg0: i32, %arg1: i32) -> (i32, i32, i32) {
    %c0_i32 = arith.constant 0 : i32
    %c0_i32_0 = arith.constant 0 : i32
    return %arg0, %c0_i32, %arg1 : i32, i32, i32
  }
  func.func @transform_1(%arg0: i32, %arg1: i32) -> (i32, i32) {
    %c0_i32 = arith.constant 0 : i32
    %c0_i32_0 = arith.constant 0 : i32
    return %arg0, %c0_i32 : i32, i32
  }
}

</mosaic_0001>

<bundles_post_ra>
// kernel: tpu_custom_call.1
= control target key start
LH: loop header
LB: loop body
LE: loop exit
PB: predicated region body
PF: predicated region fallthrough
CT: control target
= control target key end

     0   :  { %6 = vsyncpa [#allocation5], 0  ;;  %s226_s0 = inlined_call_operand.hbm [shape: f32[2,4,256], index: 0, kind: input, shape index: {}]   ;;  %s227_s1 = inlined_call_operand.hbm [shape: f32[2,8], index: 1, kind: output, shape index: {}]  }
   0x1   :  { %7 = vsyncpa [#allocation6], 0  ;;  %s12_s8 = sshll.u32 %s226_s0, 4  ;;  %s190_s9 = smov [#allocation4]   ;;  %s13_s8 = int_to_ptr.hbm [resolvable:$true] %s12_s8 }
   0x2   :  { %s14_s10 = sshll.u32 %s190_s9, 4  ;;  %s191_s11 = smov 128   ;;  %s15_s10 = int_to_ptr.vmem [resolvable:$true] %s14_s10 }
   0x3   :  { %s192_s12 = smov 8  }
   0x4   :  { %20 = dma.hbm_to_vmem [thread:$0]  %s13_s8, 256, %s15_s10, [#allocation5], %s191_s11, %s191_s11, %s192_s12  }
   0x5   :  { %186 = dma.done.wait [#allocation5], 256  }
   0x6   :  { %187 = vsyncadd [#allocation5], 4294967040  ;;  %v32_v0 = vld [vmem:[#allocation4] sm:$0xff]  ;;  %v33_v1 = vld [vmem:[#allocation4 + $0x8] sm:$0xff]  ;;  %vm47_vm0 = vcmask 1043456   ;;  %vm29_vm1 = vcmask 25600   ;;  %v82_v25 = vlaneseq }
   0x7   :  { %36 = vst [vmem:[#allocation1] ss:$2 sm:$0xff] %v32_v0  ;;  %v193_v22 = vmov 0.0   ;;  %v194_v24 = vmov -inf   ;;  %vm86_vm2 = vcmask 1041409   ;;  %s195_s0 = smov 4  }
   0x8   :  { %40 = vst [vmem:[#allocation1 + $0x10] ss:$2 sm:$0xff] %v33_v1  ;;  %v83_v26 = vand.u32 127, %v82_v25  ;;  %s196_s13 = smov [#allocation7]   ;;  %s121_s17 = sshll.u32 %s227_s1, 4  ;;  %vm112_vm3 = vcmask 58400   ;;  %s122_s17 = int_to_ptr.hbm [resolvable:$true] %s121_s17 }
   0x9   :  { %31 = vst.msk [vmem:[#allocation3] sm:$0x3] %vm29_vm1, %v193_v22  ;;  %s119_s14 = sshll.u32 %s196_s13, 4  ;;  %s120_s14 = int_to_ptr.vmem [resolvable:$true] %s119_s14 }
   0xa   :  { %30 = vst.msk [vmem:[#allocation2] sm:$0x3] %vm29_vm1, %v194_v24 }
   0xe   :  { %v37_v2 = vld.sshfl [vmem:[#allocation1] sm:$0xff pattern:$0x75316420]  ;;  %v38_v3 = vld.sshfl [vmem:[#allocation1 + $0x8] sm:$0xff pattern:$0x75316420] }
   0xf   :  { %58 = vst [vmem:[#allocation1] ss:$2 sm:$0xff] %v32_v0  ;;  %v41_v4 = vld.sshfl [vmem:[#allocation1 + $0x10] sm:$0xff pattern:$0x75316420]  ;;  %v48_v5 = vsel %vm47_vm0, %v37_v2, -inf }
  0x10   :  { %v42_v6 = vld.sshfl [vmem:[#allocation1 + $0x18] sm:$0xff pattern:$0x75316420]  ;;  %v49_v7 = vsel %vm47_vm0, %v38_v3, -inf  ;;  %v53_v9 = vsel %vm47_vm0, %v41_v4, -inf }
  0x11   :  { %62 = vst [vmem:[#allocation1 + $0x10] ss:$2 sm:$0xff] %v33_v1  ;;  %v50_v8 = vmax.f32 %v48_v5, %v49_v7  ;;  %v54_v10 = vsel %vm47_vm0, %v42_v6, -inf  ;;  %v79_v30 = vld [vmem:[#allocation2] sm:$0x3] }
  0x12   :  { %v55_v15 = vmax.f32 %v53_v9, %v54_v10  ;;  %v92_v36 = vld [vmem:[#allocation3] sm:$0x3] }
  0x13   :  { %51 = vmax.xlane.f32.xlu1 %v50_v8 }
  0x16   :  { %v59_v11 = vld.sshfl [vmem:[#allocation1] sm:$0xff pattern:$0x75316420]  ;;  %v60_v12 = vld.sshfl [vmem:[#allocation1 + $0x8] sm:$0xff pattern:$0x75316420] }
  0x17   :  { %v69_v13 = vsel %vm47_vm0, %v59_v11, 0.0  ;;  %v70_v14 = vsel %vm47_vm0, %v60_v12, 0.0 }
  0x18   :  { %v71_v16 = vadd.f32 %v70_v14, %v69_v13  ;;  %v63_v17 = vld.sshfl [vmem:[#allocation1 + $0x10] sm:$0xff pattern:$0x75316420]  ;;  %v64_v18 = vld.sshfl [vmem:[#allocation1 + $0x18] sm:$0xff pattern:$0x75316420] }
  0x19   :  { %v74_v19 = vsel %vm47_vm0, %v63_v17, 0.0  ;;  %v75_v20 = vsel %vm47_vm0, %v64_v18, 0.0 }
  0x1a   :  { %72 = vadd.xlane.f32.xlu0 %v71_v16  ;;  %v76_v21 = vadd.f32 %v75_v20, %v74_v19 }
  0x1b   :  { %56 = vmax.xlane.f32.xlu1 %v55_v15 }
  0x22   :  { %77 = vadd.xlane.f32.xlu0 %v76_v21 }
  0x86   :  { %v52_v23 = vpop.xlane.xlu1 %51 }
  0x87   :  { %v84_v28 = vperm.slane %v52_v23, %v83_v26 }
  0x8d   :  { %v73_v27 = vpop.xlane.xlu0 %72 }
  0x8e   :  { %v57_v29 = vpop.xlane.xlu1 %56  ;;  %v95_v35 = vperm.slane %v73_v27, %v83_v26 }
  0x8f   :  { %v85_v31 = vperm.slane %v57_v29, %v83_v26 }
  0x91   :  { %v87_v32 = vsel %vm86_vm2, %v85_v31, %v84_v28 }
  0x92   :  { %v89_v33 = vmax.f32 %v79_v30, %v87_v32 }
  0x94   :  { %91 = vst.msk [vmem:[#allocation2] sm:$0x3] %vm29_vm1, %v89_v33 }
  0x95   :  { %v78_v34 = vpop.xlane.xlu0 %77 }
  0x96   :  { %v96_v37 = vperm.slane %v78_v34, %v83_v26 }
  0x98   :  { %v97_v38 = vsel %vm86_vm2, %v96_v37, %v95_v35 }
  0x99   :  { %v99_v39 = vadd.f32 %v97_v38, %v92_v36 }
  0x9b   :  { %100 = vst.msk [vmem:[#allocation3] sm:$0x3] %vm29_vm1, %v99_v39  ;;  %v104_v42 = vld [vmem:[#allocation2] sm:$0x3] }
  0x9c   :  { %105 = vst.msk [vmem:[#allocation7] sm:$0x3] %vm29_vm1, %v104_v42 }
  0xa2   :  { %v106_v40 = vld [vmem:[#allocation3] sm:$0x3] }
  0xa3   :  { %v107_v41 = vmul.f32 0.00390625, %v106_v40 }
  0xa5   :  { %109 = vrot.lane.b32.xlu2 %v107_v41, %s195_s0 }
  0xff   :  { %v110_v43 = vpop.permute.xlu2 %109 }
 0x100   :  { %113 = vst.msk [vmem:[#allocation7] sm:$0x3] %vm112_vm3, %v110_v43 }
 0x101   :  { %124 = dma.vmem_to_hbm [thread:$0]  %s120_s14, 32, %s122_s17, [#allocation6]  }
 0x102   :  { %188 = dma.done.wait [#allocation6], 32  }
 0x103   :  { %189 = vsyncadd [#allocation6], 4294967264 }
 0x104   :  { %129 = vsyncpa [#allocation5], 1 }
 0x105   :  { %130 = vsyncpa [#allocation6], 1 }

</bundles_post_ra>
